<compile_context>
chip_gen: v7x
topology: tpu7x:2x2x1
jax: 0.10.0
libtpu: 0.0.40
codegen_flags: <defaults>
</compile_context>

<pallas_src>
import functools

import jax
import jax.numpy as jnp
from jax import lax
from jax.experimental import pallas as pl
from jax.experimental.pallas import tpu as pltpu


def _ccip_loss_kernel(n_total, scale_ref, img_ref, cad_ref, out_ref,
                      row_m, row_s, col_m, col_s, acc):
    i = pl.program_id(0)           # row-block index  (outer)
    j = pl.program_id(1)           # column-block index (inner, fastest)
    ni = pl.num_programs(0)
    nj = pl.num_programs(1)

    scale = scale_ref[0, 0]

    img = img_ref[...]             # [tm, D], native dtype (bf16 or f32)
    cad = cad_ref[...]             # [tn, D], native dtype

    # Fold logit_scale into the [tm, D] operand (cheaper than scaling the
    # [tm, tn] logits tile); keep the MXU operands in the native input dtype.
    img32_scaled = img.astype(jnp.float32) * scale
    img_s = img32_scaled.astype(img.dtype)

    # logits tile = (scale * img) @ cad.T — contract dim 1 of both operands so
    # the cad tile stays lane-dense [tn, D] (no XLU transpose).
    tile = lax.dot_general(
        img_s, cad,
        dimension_numbers=(((1,), (1,)), ((), ())),
        preferred_element_type=jnp.float32,
    )                              # [tm, tn] float32

    # ------------------------------ init ----------------------------------
    @pl.when(jnp.logical_and(i == 0, j == 0))
    def _():
        acc[0] = 0.0

    @pl.when(j == 0)               # new row block: reset row accumulators
    def _():
        row_m[...] = jnp.full_like(row_m, -jnp.inf)
        row_s[...] = jnp.zeros_like(row_s)

    @pl.when(i == 0)               # first row block: reset this column block's acc
    def _():
        col_m[j] = jnp.full(col_m.shape[1:], -jnp.inf, dtype=jnp.float32)
        col_s[j] = jnp.zeros(col_s.shape[1:], dtype=jnp.float32)

    # -------------- online logsumexp, row direction (logits_per_image) ----
    t_rmax = jnp.max(tile, axis=1, keepdims=True)               # [tm, 1]
    rm_new = jnp.maximum(row_m[...], t_rmax)
    row_s[...] = (row_s[...] * jnp.exp(row_m[...] - rm_new)
                  + jnp.sum(jnp.exp(tile - rm_new), axis=1, keepdims=True))
    row_m[...] = rm_new

    # -------------- online logsumexp, column direction (logits_per_cad) ---
    t_cmax = jnp.max(tile, axis=0, keepdims=True)                # [1, tn]
    cm_old = col_m[j]
    cm_new = jnp.maximum(cm_old, t_cmax)
    col_s[j] = (col_s[j] * jnp.exp(cm_old - cm_new)
                + jnp.sum(jnp.exp(tile - cm_new), axis=0, keepdims=True))
    col_m[j] = cm_new

    # ---- diagonal ("correct class" logit) via a row-wise dot, diagonal tiles only
    @pl.when(i == j)
    def _():
        diag = jnp.sum(img32_scaled * cad.astype(jnp.float32),
                       axis=-1, keepdims=True)                   # [tm, 1], scale included
        acc[0] = acc[0] - 2.0 * jnp.sum(diag)

    # ---- finalize row LSE for this row block after the last column block --
    @pl.when(j == nj - 1)
    def _():
        acc[0] = acc[0] + jnp.sum(row_m[...] + jnp.log(row_s[...]))

    # ---- finalize column LSE for this column block after the last row block
    @pl.when(i == ni - 1)
    def _():
        acc[0] = acc[0] + jnp.sum(col_m[j] + jnp.log(col_s[j]))

    # ---- write the scalar loss on the very last grid step -----------------
    @pl.when(jnp.logical_and(i == ni - 1, j == nj - 1))
    def _():
        out_ref[0, 0] = acc[0] * (0.5 / n_total)


def _pick_tile(n):
    # 256 fills the v6e/v7x 256x256 MXU; 128 matches the v5e 128x128 MXU.
    for t in (256, 128):
        if n % t == 0:
            return t
    return n                        # small / odd batch: one block along that axis


def ccip_loss(image_features, cad_features, logit_scale):
    """Scalar open_clip contrastive loss (float32). Inputs may be f32 or bf16."""
    n, d = image_features.shape
    assert cad_features.shape == (n, d)

    t = _pick_tile(n)
    ni = n // t
    nj = n // t
    scale_arr = jnp.asarray(logit_scale, dtype=jnp.float32).reshape(1, 1)

    itemsize = jnp.dtype(image_features.dtype).itemsize
    cost = pl.CostEstimate(
        flops=2 * n * n * d,                                   # the big matmul
        transcendentals=2 * n * n,                             # row + column exp passes
        bytes_accessed=(ni * nj) * 2 * t * d * itemsize + 8,   # tile DMA traffic + scalars
    )

    kernel = functools.partial(_ccip_loss_kernel, float(n))

    out = pl.pallas_call(
        kernel,
        out_shape=jax.ShapeDtypeStruct((1, 1), jnp.float32),
        grid_spec=pltpu.PrefetchScalarGridSpec(
            num_scalar_prefetch=0,
            grid=(ni, nj),
            in_specs=[
                pl.BlockSpec((1, 1), lambda i, j: (0, 0),
                             memory_space=pltpu.MemorySpace.SMEM),   # logit_scale
                pl.BlockSpec((t, d), lambda i, j: (i, 0)),           # image row block
                pl.BlockSpec((t, d), lambda i, j: (j, 0)),           # cad column block
            ],
            out_specs=pl.BlockSpec((1, 1), lambda i, j: (0, 0),
                                   memory_space=pltpu.MemorySpace.SMEM),
            scratch_shapes=[
                pltpu.VMEM((t, 1), jnp.float32),       # row running max
                pltpu.VMEM((t, 1), jnp.float32),       # row running sum
                pltpu.VMEM((nj, 1, t), jnp.float32),   # per-column-block running max
                pltpu.VMEM((nj, 1, t), jnp.float32),   # per-column-block running sum
                pltpu.SMEM((1,), jnp.float32),         # scalar loss accumulator
            ],
        ),
        compiler_params=pltpu.CompilerParams(
            # Both grid axes feed cross-step accumulators (column LSE accumulates
            # over the row axis, row LSE over the column axis), so neither axis
            # can be marked "parallel" without a per-core reduction step.
            # TODO(synk): per-core partial sums + a combine step would unlock the
            # second v7x TensorCore.
            dimension_semantics=("arbitrary", "arbitrary"),
        ),
        cost_estimate=cost,
    )(scale_arr, image_features, cad_features)
    return out[0, 0]


def _ccip_loss_ref(image_features, cad_features, logit_scale):
    """Pure-JAX reference matching the PyTorch forward."""
    img = image_features.astype(jnp.float32)
    cad = cad_features.astype(jnp.float32)
    logits_per_image = logit_scale * img @ cad.T
    logits_per_cad = logit_scale * cad @ img.T
    labels = jnp.arange(logits_per_image.shape[0])

    def ce(logits):
        lse = jax.nn.logsumexp(logits, axis=-1)
        correct = logits[jnp.arange(logits.shape[0]), labels]
        return jnp.mean(lse - correct)

    return 0.5 * (ce(logits_per_image) + ce(logits_per_cad))


if __name__ == "__main__":
    key = jax.random.PRNGKey(0)
    k1, k2, k3, k4 = jax.random.split(key, 4)
    logit_scale = jnp.float32(10.0)   # deterministic "exp(learnable temperature)"

    # Small case consistent with the module (batch of 8 paired embeddings, width 32).
    N, D = 8, 32
    img = jax.random.normal(k1, (N, D), dtype=jnp.float32)
    cad = jax.random.normal(k2, (N, D), dtype=jnp.float32)
    img = img / jnp.linalg.norm(img, axis=-1, keepdims=True)
    cad = cad / jnp.linalg.norm(cad, axis=-1, keepdims=True)

    loss = jax.block_until_ready(ccip_loss(img, cad, logit_scale))
    ref = jax.block_until_ready(_ccip_loss_ref(img, cad, logit_scale))
    assert jnp.allclose(loss, ref, rtol=1e-5, atol=1e-5), (loss, ref)

    # Second case exercising the tiled / online-logsumexp path (grid 2x2, T=256).
    N2, D2 = 512, 128
    img2 = jax.random.normal(k3, (N2, D2), dtype=jnp.float32)
    cad2 = jax.random.normal(k4, (N2, D2), dtype=jnp.float32)
    img2 = img2 / jnp.linalg.norm(img2, axis=-1, keepdims=True)
    cad2 = cad2 / jnp.linalg.norm(cad2, axis=-1, keepdims=True)

    loss2 = jax.block_until_ready(ccip_loss(img2, cad2, logit_scale))
    ref2 = jax.block_until_ready(_ccip_loss_ref(img2, cad2, logit_scale))
    assert jnp.allclose(loss2, ref2, rtol=1e-4, atol=1e-4), (loss2, ref2)

    print("KERNEL_OK")
</pallas_src>

<mosaic_0001>
module attributes {stable_mosaic.version = 11 : i64} {
  func.func @_ccip_loss_kernel(%arg0: i32, %arg1: i32, %arg2: memref<1x1xf32, #tpu.memory_space<smem>>, %arg3: memref<8x32xf32, #tpu.memory_space<vmem>>, %arg4: memref<8x32xf32, #tpu.memory_space<vmem>>, %arg5: memref<1x1xf32, #tpu.memory_space<smem>>, %arg6: memref<8x1xf32, #tpu.memory_space<vmem>>, %arg7: memref<8x1xf32, #tpu.memory_space<vmem>>, %arg8: memref<1x1x8xf32, #tpu.memory_space<vmem>>, %arg9: memref<1x1x8xf32, #tpu.memory_space<vmem>>, %arg10: memref<1xf32, #tpu.memory_space<smem>>) attributes {dimension_semantics = [#tpu.dimension_semantics<arbitrary>, #tpu.dimension_semantics<arbitrary>], iteration_bounds = array<i64: 1, 1>, scalar_prefetch = 0 : i64, scratch_operands = 5 : i64, tpu.core_type = #tpu.core_type<tc>, window_params = [{transform_indices = @transform_0, window_bounds = array<i64: 1, 1>}, {transform_indices = @transform_1, window_bounds = array<i64: 8, 32>}, {transform_indices = @transform_2, window_bounds = array<i64: 8, 32>}, {transform_indices = @transform_3, window_bounds = array<i64: 1, 1>}]} {
    %c0 = arith.constant 0 : index
    %c0_0 = arith.constant 0 : index
    %0 = memref.load %arg2[%c0, %c0_0] : memref<1x1xf32, #tpu.memory_space<smem>>
    %c0_1 = arith.constant 0 : index
    %c0_2 = arith.constant 0 : index
    %1 = vector.load %arg3[%c0_1, %c0_2] : memref<8x32xf32, #tpu.memory_space<vmem>>, vector<8x32xf32>
    %c0_3 = arith.constant 0 : index
    %c0_4 = arith.constant 0 : index
    %2 = vector.load %arg4[%c0_3, %c0_4] : memref<8x32xf32, #tpu.memory_space<vmem>>, vector<8x32xf32>
    %3 = vector.broadcast %0 : f32 to vector<8x32xf32>
    %4 = arith.mulf %1, %3 : vector<8x32xf32>
    %cst = arith.constant dense<0.000000e+00> : vector<8x8xf32>
    %5 = tpu.matmul %4, %2, %cst {dimension_numbers = #tpu.dot_dimension_numbers<[1], [1], [0], [0], [0, 0, 1, 0], [], []>} : vector<8x32xf32>, vector<8x32xf32>, vector<8x8xf32> -> vector<8x8xf32>
    %c0_i32 = arith.constant 0 : i32
    %6 = arith.cmpi eq, %arg0, %c0_i32 : i32
    %c0_i32_5 = arith.constant 0 : i32
    %7 = arith.cmpi eq, %arg1, %c0_i32_5 : i32
    %8 = arith.andi %6, %7 : i1
    %9 = arith.extui %8 : i1 to i32
    %c0_i32_6 = arith.constant 0 : i32
    %10 = arith.cmpi ne, %9, %c0_i32_6 : i32
    scf.if %10 {
      %cst_41 = arith.constant 0.000000e+00 : f32
      %c0_42 = arith.constant 0 : index
      %74 = memref.load %arg10[%c0_42] : memref<1xf32, #tpu.memory_space<smem>>
      memref.store %cst_41, %arg10[%c0_42] : memref<1xf32, #tpu.memory_space<smem>>
    } else {
    }
    %c0_i32_7 = arith.constant 0 : i32
    %11 = arith.cmpi eq, %arg1, %c0_i32_7 : i32
    %12 = arith.extui %11 : i1 to i32
    %c0_i32_8 = arith.constant 0 : i32
    %13 = arith.cmpi ne, %12, %c0_i32_8 : i32
    scf.if %13 {
      %cst_41 = arith.constant 0xFF800000 : f32
      %74 = vector.broadcast %cst_41 : f32 to vector<8x1xf32>
      %c0_42 = arith.constant 0 : index
      %c0_43 = arith.constant 0 : index
      %75 = vector.load %arg6[%c0_42, %c0_43] : memref<8x1xf32, #tpu.memory_space<vmem>>, vector<8x1xf32>
      tpu.vector_store %arg6[%c0_42, %c0_43], %74 {strides = array<i32>} : memref<8x1xf32, #tpu.memory_space<vmem>>, vector<8x1xf32>,
      %cst_44 = arith.constant 0.000000e+00 : f32
      %76 = vector.broadcast %cst_44 : f32 to vector<8x1xf32>
      %c0_45 = arith.constant 0 : index
      %c0_46 = arith.constant 0 : index
      %77 = vector.load %arg7[%c0_45, %c0_46] : memref<8x1xf32, #tpu.memory_space<vmem>>, vector<8x1xf32>
      tpu.vector_store %arg7[%c0_45, %c0_46], %76 {strides = array<i32>} : memref<8x1xf32, #tpu.memory_space<vmem>>, vector<8x1xf32>,
    } else {
    }
    %c0_i32_9 = arith.constant 0 : i32
    %14 = arith.cmpi eq, %arg0, %c0_i32_9 : i32
    %15 = arith.extui %14 : i1 to i32
    %c0_i32_10 = arith.constant 0 : i32
    %16 = arith.cmpi ne, %15, %c0_i32_10 : i32
    scf.if %16 {
      %cst_41 = arith.constant 0xFF800000 : f32
      %74 = vector.broadcast %cst_41 : f32 to vector<1x8xf32>
      %75 = arith.index_cast %arg1 : i32 to index
      %c0_42 = arith.constant 0 : index
      %c0_43 = arith.constant 0 : index
      %76 = vector.load %arg8[%75, %c0_42, %c0_43] : memref<1x1x8xf32, #tpu.memory_space<vmem>>, vector<1x1x8xf32>
      %77 = vector.shape_cast %76 : vector<1x1x8xf32> to vector<1x8xf32>
      %78 = vector.shape_cast %74 : vector<1x8xf32> to vector<1x1x8xf32>
      tpu.vector_store %arg8[%75, %c0_42, %c0_43], %78 {strides = array<i32>} : memref<1x1x8xf32, #tpu.memory_space<vmem>>, vector<1x1x8xf32>,
      %cst_44 = arith.constant 0.000000e+00 : f32
      %79 = vector.broadcast %cst_44 : f32 to vector<1x8xf32>
      %80 = arith.index_cast %arg1 : i32 to index
      %c0_45 = arith.constant 0 : index
      %c0_46 = arith.constant 0 : index
      %81 = vector.load %arg9[%80, %c0_45, %c0_46] : memref<1x1x8xf32, #tpu.memory_space<vmem>>, vector<1x1x8xf32>
      %82 = vector.shape_cast %81 : vector<1x1x8xf32> to vector<1x8xf32>
      %83 = vector.shape_cast %79 : vector<1x8xf32> to vector<1x1x8xf32>
      tpu.vector_store %arg9[%80, %c0_45, %c0_46], %83 {strides = array<i32>} : memref<1x1x8xf32, #tpu.memory_space<vmem>>, vector<1x1x8xf32>,
    } else {
    }
    %cst_11 = arith.constant dense<0xFF800000> : vector<8xf32>
    %17 = vector.multi_reduction <maximumf>, %5, %cst_11 [1] : vector<8x8xf32> to vector<8xf32>
    %18 = vector.shape_cast %17 : vector<8xf32> to vector<8x1xf32>
    %c0_12 = arith.constant 0 : index
    %c0_13 = arith.constant 0 : index
    %19 = vector.load %arg6[%c0_12, %c0_13] : memref<8x1xf32, #tpu.memory_space<vmem>>, vector<8x1xf32>
    %20 = arith.maximumf %19, %18 : vector<8x1xf32>
    %c0_14 = arith.constant 0 : index
    %c0_15 = arith.constant 0 : index
    %21 = vector.load %arg7[%c0_14, %c0_15] : memref<8x1xf32, #tpu.memory_space<vmem>>, vector<8x1xf32>
    %c0_16 = arith.constant 0 : index
    %c0_17 = arith.constant 0 : index
    %22 = vector.load %arg6[%c0_16, %c0_17] : memref<8x1xf32, #tpu.memory_space<vmem>>, vector<8x1xf32>
    %23 = arith.subf %22, %20 : vector<8x1xf32>
    %24 = math.exp %23 : vector<8x1xf32>
    %25 = arith.mulf %21, %24 : vector<8x1xf32>
    %26 = vector.broadcast %20 : vector<8x1xf32> to vector<8x8xf32>
    %27 = arith.subf %5, %26 : vector<8x8xf32>
    %28 = math.exp %27 : vector<8x8xf32>
    %cst_18 = arith.constant dense<0.000000e+00> : vector<8xf32>
    %29 = vector.multi_reduction <add>, %28, %cst_18 [1] : vector<8x8xf32> to vector<8xf32>
    %30 = vector.shape_cast %29 : vector<8xf32> to vector<8x1xf32>
    %31 = arith.addf %25, %30 : vector<8x1xf32>
    %c0_19 = arith.constant 0 : index
    %c0_20 = arith.constant 0 : index
    %32 = vector.load %arg7[%c0_19, %c0_20] : memref<8x1xf32, #tpu.memory_space<vmem>>, vector<8x1xf32>
    tpu.vector_store %arg7[%c0_19, %c0_20], %31 {strides = array<i32>} : memref<8x1xf32, #tpu.memory_space<vmem>>, vector<8x1xf32>,
    %c0_21 = arith.constant 0 : index
    %c0_22 = arith.constant 0 : index
    %33 = vector.load %arg6[%c0_21, %c0_22] : memref<8x1xf32, #tpu.memory_space<vmem>>, vector<8x1xf32>
    tpu.vector_store %arg6[%c0_21, %c0_22], %20 {strides = array<i32>} : memref<8x1xf32, #tpu.memory_space<vmem>>, vector<8x1xf32>,
    %cst_23 = arith.constant dense<0xFF800000> : vector<8xf32>
    %34 = vector.multi_reduction <maximumf>, %5, %cst_23 [0] : vector<8x8xf32> to vector<8xf32>
    %35 = vector.shape_cast %34 : vector<8xf32> to vector<1x8xf32>
    %36 = arith.index_cast %arg1 : i32 to index
    %c0_24 = arith.constant 0 : index
    %c0_25 = arith.constant 0 : index
    %37 = vector.load %arg8[%36, %c0_24, %c0_25] : memref<1x1x8xf32, #tpu.memory_space<vmem>>, vector<1x1x8xf32>
    %38 = vector.shape_cast %37 : vector<1x1x8xf32> to vector<1x8xf32>
    %39 = arith.maximumf %38, %35 : vector<1x8xf32>
    %40 = arith.index_cast %arg1 : i32 to index
    %c0_26 = arith.constant 0 : index
    %c0_27 = arith.constant 0 : index
    %41 = vector.load %arg9[%40, %c0_26, %c0_27] : memref<1x1x8xf32, #tpu.memory_space<vmem>>, vector<1x1x8xf32>
    %42 = vector.shape_cast %41 : vector<1x1x8xf32> to vector<1x8xf32>
    %43 = arith.subf %38, %39 : vector<1x8xf32>
    %44 = math.exp %43 : vector<1x8xf32>
    %45 = arith.mulf %42, %44 : vector<1x8xf32>
    %46 = vector.broadcast %39 : vector<1x8xf32> to vector<8x8xf32>
    %47 = arith.subf %5, %46 : vector<8x8xf32>
    %48 = math.exp %47 : vector<8x8xf32>
    %cst_28 = arith.constant dense<0.000000e+00> : vector<8xf32>
    %49 = vector.multi_reduction <add>, %48, %cst_28 [0] : vector<8x8xf32> to vector<8xf32>
    %50 = vector.shape_cast %49 : vector<8xf32> to vector<1x8xf32>
    %51 = arith.addf %45, %50 : vector<1x8xf32>
    %52 = arith.index_cast %arg1 : i32 to index
    %c0_29 = arith.constant 0 : index
    %c0_30 = arith.constant 0 : index
    %53 = vector.load %arg9[%52, %c0_29, %c0_30] : memref<1x1x8xf32, #tpu.memory_space<vmem>>, vector<1x1x8xf32>
    %54 = vector.shape_cast %53 : vector<1x1x8xf32> to vector<1x8xf32>
    %55 = vector.shape_cast %51 : vector<1x8xf32> to vector<1x1x8xf32>
    tpu.vector_store %arg9[%52, %c0_29, %c0_30], %55 {strides = array<i32>} : memref<1x1x8xf32, #tpu.memory_space<vmem>>, vector<1x1x8xf32>,
    %56 = arith.index_cast %arg1 : i32 to index
    %c0_31 = arith.constant 0 : index
    %c0_32 = arith.constant 0 : index
    %57 = vector.load %arg8[%56, %c0_31, %c0_32] : memref<1x1x8xf32, #tpu.memory_space<vmem>>, vector<1x1x8xf32>
    %58 = vector.shape_cast %57 : vector<1x1x8xf32> to vector<1x8xf32>
    %59 = vector.shape_cast %39 : vector<1x8xf32> to vector<1x1x8xf32>
    tpu.vector_store %arg8[%56, %c0_31, %c0_32], %59 {strides = array<i32>} : memref<1x1x8xf32, #tpu.memory_space<vmem>>, vector<1x1x8xf32>,
    %60 = arith.cmpi eq, %arg0, %arg1 : i32
    %61 = arith.extui %60 : i1 to i32
    %c0_i32_33 = arith.constant 0 : i32
    %62 = arith.cmpi ne, %61, %c0_i32_33 : i32
    scf.if %62 {
      %74 = arith.mulf %4, %2 : vector<8x32xf32>
      %cst_41 = arith.constant dense<0.000000e+00> : vector<8xf32>
      %75 = vector.multi_reduction <add>, %74, %cst_41 [1] : vector<8x32xf32> to vector<8xf32>
      %76 = vector.shape_cast %75 : vector<8xf32> to vector<8x1xf32>
      %c0_42 = arith.constant 0 : index
      %77 = memref.load %arg10[%c0_42] : memref<1xf32, #tpu.memory_space<smem>>
      %78 = vector.shape_cast %76 : vector<8x1xf32> to vector<1x8x1xf32>
      %cst_43 = arith.constant dense<0.000000e+00> : vector<1xf32>
      %79 = vector.multi_reduction <add>, %78, %cst_43 [1, 2] : vector<1x8x1xf32> to vector<1xf32>
      %80 = vector.shape_cast %79 : vector<1xf32> to vector<1x1x1xf32>
      %81 = vector.extract %80[0, 0, 0] : f32 from vector<1x1x1xf32>
      %cst_44 = arith.constant 2.000000e+00 : f32
      %82 = arith.mulf %cst_44, %81 : f32
      %83 = arith.subf %77, %82 : f32
      %c0_45 = arith.constant 0 : index
      %84 = memref.load %arg10[%c0_45] : memref<1xf32, #tpu.memory_space<smem>>
      memref.store %83, %arg10[%c0_45] : memref<1xf32, #tpu.memory_space<smem>>
    } else {
    }
    %c0_i32_34 = arith.constant 0 : i32
    %63 = arith.cmpi eq, %arg1, %c0_i32_34 : i32
    %64 = arith.extui %63 : i1 to i32
    %c0_i32_35 = arith.constant 0 : i32
    %65 = arith.cmpi ne, %64, %c0_i32_35 : i32
    scf.if %65 {
      %c0_41 = arith.constant 0 : index
      %74 = memref.load %arg10[%c0_41] : memref<1xf32, #tpu.memory_space<smem>>
      %c0_42 = arith.constant 0 : index
      %c0_43 = arith.constant 0 : index
      %75 = vector.load %arg6[%c0_42, %c0_43] : memref<8x1xf32, #tpu.memory_space<vmem>>, vector<8x1xf32>
      %c0_44 = arith.constant 0 : index
      %c0_45 = arith.constant 0 : index
      %76 = vector.load %arg7[%c0_44, %c0_45] : memref<8x1xf32, #tpu.memory_space<vmem>>, vector<8x1xf32>
      %77 = math.log %76 : vector<8x1xf32>
      %78 = arith.addf %75, %77 : vector<8x1xf32>
      %79 = vector.shape_cast %78 : vector<8x1xf32> to vector<1x8x1xf32>
      %cst_46 = arith.constant dense<0.000000e+00> : vector<1xf32>
      %80 = vector.multi_reduction <add>, %79, %cst_46 [1, 2] : vector<1x8x1xf32> to vector<1xf32>
      %81 = vector.shape_cast %80 : vector<1xf32> to vector<1x1x1xf32>
      %82 = vector.extract %81[0, 0, 0] : f32 from vector<1x1x1xf32>
      %83 = arith.addf %74, %82 : f32
      %c0_47 = arith.constant 0 : index
      %84 = memref.load %arg10[%c0_47] : memref<1xf32, #tpu.memory_space<smem>>
      memref.store %83, %arg10[%c0_47] : memref<1xf32, #tpu.memory_space<smem>>
    } else {
    }
    %c0_i32_36 = arith.constant 0 : i32
    %66 = arith.cmpi eq, %arg0, %c0_i32_36 : i32
    %67 = arith.extui %66 : i1 to i32
    %c0_i32_37 = arith.constant 0 : i32
    %68 = arith.cmpi ne, %67, %c0_i32_37 : i32
    scf.if %68 {
      %c0_41 = arith.constant 0 : index
      %74 = memref.load %arg10[%c0_41] : memref<1xf32, #tpu.memory_space<smem>>
      %75 = arith.index_cast %arg1 : i32 to index
      %c0_42 = arith.constant 0 : index
      %c0_43 = arith.constant 0 : index
      %76 = vector.load %arg8[%75, %c0_42, %c0_43] : memref<1x1x8xf32, #tpu.memory_space<vmem>>, vector<1x1x8xf32>
      %77 = vector.shape_cast %76 : vector<1x1x8xf32> to vector<1x8xf32>
      %78 = arith.index_cast %arg1 : i32 to index
      %c0_44 = arith.constant 0 : index
      %c0_45 = arith.constant 0 : index
      %79 = vector.load %arg9[%78, %c0_44, %c0_45] : memref<1x1x8xf32, #tpu.memory_space<vmem>>, vector<1x1x8xf32>
      %80 = vector.shape_cast %79 : vector<1x1x8xf32> to vector<1x8xf32>
      %81 = math.log %80 : vector<1x8xf32>
      %82 = arith.addf %77, %81 : vector<1x8xf32>
      %83 = vector.shape_cast %82 : vector<1x8xf32> to vector<1x1x8xf32>
      %cst_46 = arith.constant dense<0.000000e+00> : vector<1xf32>
      %84 = vector.multi_reduction <add>, %83, %cst_46 [1, 2] : vector<1x1x8xf32> to vector<1xf32>
      %85 = vector.shape_cast %84 : vector<1xf32> to vector<1x1x1xf32>
      %86 = vector.extract %85[0, 0, 0] : f32 from vector<1x1x1xf32>
      %87 = arith.addf %74, %86 : f32
      %c0_47 = arith.constant 0 : index
      %88 = memref.load %arg10[%c0_47] : memref<1xf32, #tpu.memory_space<smem>>
      memref.store %87, %arg10[%c0_47] : memref<1xf32, #tpu.memory_space<smem>>
    } else {
    }
    %c0_i32_38 = arith.constant 0 : i32
    %69 = arith.cmpi eq, %arg0, %c0_i32_38 : i32
    %c0_i32_39 = arith.constant 0 : i32
    %70 = arith.cmpi eq, %arg1, %c0_i32_39 : i32
    %71 = arith.andi %69, %70 : i1
    %72 = arith.extui %71 : i1 to i32
    %c0_i32_40 = arith.constant 0 : i32
    %73 = arith.cmpi ne, %72, %c0_i32_40 : i32
    scf.if %73 {
      %c0_41 = arith.constant 0 : index
      %74 = memref.load %arg10[%c0_41] : memref<1xf32, #tpu.memory_space<smem>>
      %cst_42 = arith.constant 6.250000e-02 : f32
      %75 = arith.mulf %74, %cst_42 : f32
      %c0_43 = arith.constant 0 : index
      %c0_44 = arith.constant 0 : index
      %76 = memref.load %arg5[%c0_43, %c0_44] : memref<1x1xf32, #tpu.memory_space<smem>>
      memref.store %75, %arg5[%c0_43, %c0_44] : memref<1x1xf32, #tpu.memory_space<smem>>
    } else {
    }
    return
  }
  func.func @transform_0(%arg0: i32, %arg1: i32) -> (i32, i32) {
    %c0_i32 = arith.constant 0 : i32
    %c0_i32_0 = arith.constant 0 : i32
    %c0_i32_1 = arith.constant 0 : i32
    return %c0_i32, %c0_i32_0 : i32, i32
  }
  func.func @transform_1(%arg0: i32, %arg1: i32) -> (i32, i32) {
    %c0_i32 = arith.constant 0 : i32
    %c0_i32_0 = arith.constant 0 : i32
    return %arg0, %c0_i32 : i32, i32
  }
  func.func @transform_2(%arg0: i32, %arg1: i32) -> (i32, i32) {
    %c0_i32 = arith.constant 0 : i32
    %c0_i32_0 = arith.constant 0 : i32
    return %arg1, %c0_i32 : i32, i32
  }
  func.func @transform_3(%arg0: i32, %arg1: i32) -> (i32, i32) {
    %c0_i32 = arith.constant 0 : i32
    %c0_i32_0 = arith.constant 0 : i32
    %c0_i32_1 = arith.constant 0 : i32
    return %c0_i32, %c0_i32_0 : i32, i32
  }
}

</mosaic_0001>

<bundles_post_ra>
// kernel: tpu_custom_call.1
= control target key start
LH: loop header
LB: loop body
LE: loop exit
PB: predicated region body
PF: predicated region fallthrough
CT: control target
= control target key end

     0   :  { %9 = vsyncpa [#allocation9], 0  ;;  %s467_s0 = inlined_call_operand.<no memory space> [shape: f32[1,1], index: 0, kind: input, shape index: {}]   ;;  %s468_s1 = inlined_call_operand.hbm [shape: f32[8,32], index: 1, kind: input, shape index: {}]   ;;  %s469_s2 = inlined_call_operand.hbm [shape: f32[8,32], index: 2, kind: input, shape index: {}]   ;;  %s470_s3 = inlined_call_operand.hbm [shape: f32[1,1], index: 3, kind: output, shape index: {}]  }
   0x1   :  { %10 = vsyncpa [#allocation12], 0 }
   0x2   :  { %11 = vsyncpa [#allocation10], 0  ;;  %s384_s12 = smov [#allocation8]   ;;  %s385_s14 = smov [#allocation11]  }
   0x3   :  { %s20_s13 = sshll.u32 %s384_s12, 4  ;;  %s30_s15 = sshll.u32 %s385_s14, 4  ;;  %s21_s13 = int_to_ptr.vmem [resolvable:$true] %s20_s13  ;;  %s31_s15 = int_to_ptr.vmem [resolvable:$true] %s30_s15 }
   0x4   :  { %s324_s18 = scalar_lea.hbm %s468_s1, 128 }
   0x5   :  { %p325_p0 = scmp.ne.s32.totalorder %s468_s1, %s324_s18  ;;  %p328_p1 = scmp.lt.u32.totalorder %s324_s18, %s468_s1 }
   0x7   :  { %p330_p2 = pnand %p328_p1, %p325_p0 }
   0x9   :  { %333 = shalt.err (!%p330_p2)
}
   0xa   :  { %s334_s23 = scalar_lea.vmem %s21_s13, 128  ;;  %p339_p4 = scmp.lt.s32.totalorder %s21_s13, %s21_s13 }
   0xb   :  { %p335_p3 = scmp.ne.s32.totalorder %s21_s13, %s334_s23  ;;  %p340_p5 = scmp.lt.s32.totalorder %s334_s23, %s334_s23 }
   0xd   :  { %p341_p6 = por %p340_p5, %p339_p4 }
   0xf   :  { %p342_p7 = pnand %p341_p6, %p335_p3 }
  0x11   :  { %345 = shalt.err (!%p342_p7)
}
  0x12   :  { %23 = dma.hbm_to_vmem [thread:$0]  %s468_s1, 128, %s21_s13, [#allocation9]  }
  0x13   :  { %s346_s28 = scalar_lea.hbm %s469_s2, 128 }
  0x14   :  { %p347_p8 = scmp.ne.s32.totalorder %s469_s2, %s346_s28  ;;  %p350_p9 = scmp.lt.u32.totalorder %s346_s28, %s469_s2 }
  0x16   :  { %p352_p10 = pnand %p350_p9, %p347_p8 }
  0x18   :  { %355 = shalt.err (!%p352_p10)
}
  0x19   :  { %s356_s6 = scalar_lea.vmem %s31_s15, 128  ;;  %p361_p12 = scmp.lt.s32.totalorder %s31_s15, %s31_s15 }
  0x1a   :  { %p357_p11 = scmp.ne.s32.totalorder %s31_s15, %s356_s6  ;;  %p362_p13 = scmp.lt.s32.totalorder %s356_s6, %s356_s6 }
  0x1c   :  { %p363_p0 = por %p362_p13, %p361_p12 }
  0x1e   :  { %p364_p1 = pnand %p363_p0, %p357_p11 }
  0x20   :  { %367 = shalt.err (!%p364_p1)
}
  0x21   :  { %33 = dma.hbm_to_vmem [thread:$0]  %s469_s2, 128, %s31_s15, [#allocation12]  }
  0x22   :  { %378 = dma.done.wait [#allocation9], 128  }
  0x23   :  { %379 = vsyncadd [#allocation9], 4294967168 }
  0x24   :  { %380 = dma.done.wait [#allocation12], 128  }
  0x25   :  { %381 = vsyncadd [#allocation12], 4294967168  ;;  %vm133_vm0 = vcmask 7168   ;;  %v386_v0 = vmov 0.0   ;;  %vm387_vm1 = vmmov 0   ;;  %vm45_vm2 = vcmask 261120  }
  0x26   :  { %293 = vmatprep.subr.mxu0 %v386_v0  ;;  %135 = vst.msk [vmem:[#allocation3] sm:$0xff] %vm133_vm0, %v386_v0  ;;  %295 = vmatprep.mubr.msk.f32.mxu0 %vm387_vm1, %v386_v0  ;;  %v43_v1 = vstv %s467_s0  ;;  %v42_v2 = vld [vmem:[#allocation11] sm:$0xff]  ;;  %v41_v3 = vld [vmem:[#allocation8] sm:$0xff]  ;;  %vm139_vm3 = vcmask 57344   ;;  %v388_v5 = vmov -inf   ;;  %vm142_vm4 = vcmask 64512  }
  0x27   :  { %294 = vmatpush3.xpose.msk.msra.mxu0 %vm45_vm2, %v42_v2  ;;  %v44_v4 = vmul.f32 %v43_v1, %v41_v3  ;;  %140 = vst.msk [vmem:[#allocation4] sm:$0x1] %vm139_vm3, %v388_v5  ;;  %141 = vst.msk [vmem:[#allocation5] sm:$0x1] %vm139_vm3, %v386_v0  ;;  %v182_v10 = vlaneseq  ;;  %v389_v21 = vmov 0   ;;  %s368_s18 = scalar_lea.hbm %s470_s3, 16 }
  0x28   :  { %134 = vst.msk [vmem:[#allocation2] sm:$0xff] %vm133_vm0, %v388_v5  ;;  %311 = vset.pattern.permute.xlu0 %v389_v21  ;;  %p369_p2 = scmp.ne.s32.totalorder %s470_s3, %s368_s18  ;;  %p372_p3 = scmp.lt.u32.totalorder %s368_s18, %s470_s3 }
  0x29   :  { %v183_v13 = vshrl.u32 %v182_v10, 7  ;;  %v205_v45 = vmul.f32 %v44_v4, %v42_v2 }
  0x2a   :  { %296 = vmatmul.mubr.msk.f32.vlgmr.msra.gmra.mrb[0].mxu0 %vm45_vm2, %v44_v4  ;;  %p374_p4 = pnand %p372_p3, %p369_p2 }
  0x2b   :  { %v184_v17 = vsub.s32 0, %v183_v13  ;;  %v206_v48 = vsel %vm45_vm2, %v205_v45, 0.0 }
  0x2d   :  { %v148_v51 = vld [vmem:[#allocation3] sm:$0xff] }
  0x2e   :  { %v174_v16 = vld [vmem:[#allocation4] sm:$0x1]  ;;  %v176_v33 = vld [vmem:[#allocation5] sm:$0x1] }
  0x2f   :  { %v146_v38 = vld [vmem:[#allocation2] sm:$0xff] }
  0xfd   :  { %v118_v6 = vpop.f32.mrb[0].mxu0 }
  0xfe   :  { %v297_v7 = vpop.f32.mrb[1].mxu0  ;;  %v143_v8 = vsel %vm142_vm4, %v118_v6, -inf }
  0xff   :  { %144 = vmax.xlane.f32.xlu0 %v143_v8  ;;  %v168_v9 = vrot.slane %v143_v8, 4 }
 0x101   :  { %v169_v11 = vmax.f32 %v143_v8, %v168_v9 }
 0x103   :  { %v170_v12 = vrot.slane %v169_v11, 2 }
 0x105   :  { %v171_v14 = vmax.f32 %v169_v11, %v170_v12 }
 0x107   :  { %v172_v15 = vrot.slane %v171_v14, 1 }
 0x109   :  { %v173_v18 = vmax.f32 %v171_v14, %v172_v15 }
 0x10b   :  { %v175_v19 = vmax.f32 %v174_v16, %v173_v18 }
 0x10d   :  { %v185_v20 = vrot.slane %v175_v19, %v184_v17  ;;  %200 = vst.msk [vmem:[#allocation4] sm:$0x1] %vm139_vm3, %v175_v19  ;;  %v177_v24 = vsub.f32 %v174_v16, %v175_v19 }
 0x10f   :  { %v187_v22 = vsub.f32 %v118_v6, %v185_v20  ;;  %v178_v25 = vmul.f32 1.442695, %v177_v24 }
 0x111   :  { %v188_v23 = vmul.f32 1.442695, %v187_v22 }
 0x113   :  { %312 = vpow2.f32 %v188_v23 }
 0x114   :  { %314 = vpow2.f32 %v178_v25  ;;  %v250_v1 = vld [vmem:[#allocation4] sm:$0x1] }
 0x11d   :  { %v313_v26 = vpop.eup %312 }
 0x11e   :  { %v190_v27 = vsel %vm142_vm4, %v313_v26, 0.0  ;;  %v315_v32 = vpop.eup %314 }
 0x11f   :  { %v191_v28 = vrot.slane %v190_v27, 4  ;;  %v180_v36 = vmul.f32 %v315_v32, %v176_v33 }
 0x121   :  { %v192_v29 = vadd.f32 %v191_v28, %v190_v27 }
 0x123   :  { %v193_v30 = vrot.slane %v192_v29, 2 }
 0x125   :  { %v194_v31 = vadd.f32 %v193_v30, %v192_v29 }
 0x127   :  { %v195_v34 = vrot.slane %v194_v31, 1 }
 0x129   :  { %v196_v35 = vadd.f32 %v195_v34, %v194_v31 }
 0x12b   :  { %v197_v37 = vadd.f32 %v196_v35, %v180_v36 }
 0x12d   :  { %199 = vst.msk [vmem:[#allocation5] sm:$0x1] %vm139_vm3, %v197_v37 }
 0x134   :  { %v251_v57 = vld [vmem:[#allocation5] sm:$0x1] }
 0x18c   :  { %v145_v39 = vpop.xlane.xlu0 %144 }
 0x18d   :  { %v147_v40 = vmax.f32 %v146_v38, %v145_v39 }
 0x18f   :  { %v149_v41 = vsub.f32 %v146_v38, %v147_v40  ;;  %167 = vst.msk [vmem:[#allocation2] sm:$0xff] %vm133_vm0, %v147_v40  ;;  %155 = vperm.xlu0 %311, %v147_v40  }
 0x191   :  { %v150_v49 = vmul.f32 1.442695, %v149_v41 }
 0x196   :  { %v228_v63 = vld [vmem:[#allocation2] sm:$0xff] }
 0x20e   :  { %v156_v42 = vpop.permute.xlu0 %155 }
 0x20f   :  { %v158_v43 = vsub.f32 %v118_v6, %v156_v42 }
 0x211   :  { %v159_v44 = vmul.f32 1.442695, %v158_v43 }
 0x213   :  { %316 = vpow2.f32 %v159_v44 }
 0x214   :  { %318 = vpow2.f32 %v150_v49 }
 0x215   :  { %320 = vlog2.f32 %v251_v57 }
 0x21d   :  { %v317_v46 = vpop.eup %316 }
 0x21e   :  { %v161_v47 = vsel %vm142_vm4, %v317_v46, 0.0  ;;  %v319_v50 = vpop.eup %318 }
 0x21f   :  { %162 = vadd.xlane.f32.xlu1 %v161_v47  ;;  %v152_v52 = vmul.f32 %v319_v50, %v148_v51  ;;  %v321_v59 = vpop.eup %320 }
 0x220   :  { %v253_v62 = vmul.f32 0.6931472, %v321_v59 }
 0x222   :  { %v254_v3 = vadd.f32 %v253_v62, %v250_v1 }
 0x223   :  { %207 = vadd.xlane.f32.xlu1 %v206_v48 }
 0x224   :  { %v255_v4 = vsel %vm139_vm3, %v254_v3, 0.0 }
 0x2ac   :  { %v163_v53 = vpop.xlane.xlu1 %162 }
 0x2ad   :  { %v164_v54 = vadd.f32 %v163_v53, %v152_v52 }
 0x2af   :  { %166 = vst.msk [vmem:[#allocation3] sm:$0xff] %vm133_vm0, %v164_v54 }
 0x2b0   :  { %v208_v55 = vpop.xlane.xlu1 %207 }
 0x2b1   :  { %v210_v56 = vsel %vm133_vm0, %v208_v55, 0.0 }
 0x2b2   :  { %211 = vadd.xlane.f32.xlu1 %v210_v56 }
 0x2b6   :  { %v229_v58 = vld [vmem:[#allocation3] sm:$0xff] }
 0x2b7   :  { %322 = vlog2.f32 %v229_v58 }
 0x2c1   :  { %v323_v60 = vpop.eup %322 }
 0x2c2   :  { %v231_v61 = vmul.f32 0.6931472, %v323_v60 }
 0x2c4   :  { %v232_v0 = vadd.f32 %v231_v61, %v228_v63 }
 0x2c6   :  { %v233_v2 = vsel %vm133_vm0, %v232_v0, 0.0 }
 0x2c7   :  { %234 = vadd.xlane.f32.xlu1 %v233_v2 }
 0x2cb   :  { %256 = vadd.xlane.f32.xlu1 %v255_v4 }
 0x33f   :  { %v212_v5 = vpop.xlane.xlu1 %211 }
 0x340   :  { %v213_v6 = vrot.slane %v212_v5, 4 }
 0x342   :  { %v214_v7 = vadd.f32 %v213_v6, %v212_v5 }
 0x344   :  { %v215_v8 = vrot.slane %v214_v7, 2 }
 0x346   :  { %v216_v9 = vadd.f32 %v215_v8, %v214_v7 }
 0x348   :  { %v217_v10 = vrot.slane %v216_v9, 1 }
 0x34a   :  { %v218_v11 = vadd.f32 %v217_v10, %v216_v9 }
 0x34c   :  { %298 = vpush %v218_v11 }
 0x354   :  { %v235_v12 = vpop.xlane.xlu1 %234 }
 0x355   :  { %v236_v13 = vrot.slane %v235_v12, 4 }
 0x357   :  { %v237_v14 = vadd.f32 %v236_v13, %v235_v12 }
 0x358   :  { %v257_v15 = vpop.xlane.xlu1 %256 }
 0x359   :  { %v238_v16 = vrot.slane %v237_v14, 2  ;;  %v258_v17 = vrot.slane %v257_v15, 4 }
 0x35b   :  { %v259_v18 = vadd.f32 %v258_v17, %v257_v15  ;;  %v239_v19 = vadd.f32 %v238_v16, %v237_v14 }
 0x35d   :  { %v260_v20 = vrot.slane %v259_v18, 2  ;;  %v240_v21 = vrot.slane %v239_v19, 1 }
 0x35f   :  { %v261_v22 = vadd.f32 %v260_v20, %v259_v18  ;;  %v241_v23 = vadd.f32 %v240_v21, %v239_v19 }
 0x361   :  { %300 = vpush %v241_v23  ;;  %v262_v24 = vrot.slane %v261_v22, 1 }
 0x363   :  { %v263_v25 = vadd.f32 %v262_v24, %v261_v22 }
 0x365   :  { %302 = vpush %v263_v25 }
 0x37d   :  { %s299_s0 = spop %298 }
 0x37e   :  { %s220_s2 = smul.f32 2.0, %s299_s0 }
 0x380   :  { %s221_s11 = ssub.f32 0.0, %s220_s2 }
 0x392   :  { %s301_s10 = spop %300 }
 0x393   :  { %s243_s12 = sadd.f32 %s301_s10, %s221_s11 }
 0x396   :  { %s303_s13 = spop %302 }
 0x397   :  { %s265_s14 = sadd.f32 %s303_s13, %s243_s12 }
 0x399   :  { %s271_s15 = smul.f32 0.0625, %s265_s14 }
 0x39b   :  { %273 = sst [smem:[#allocation13]] %s271_s15 }
 0x39c   :  { %377 = shalt.err (!%p374_p4)
}
 0x39d   :  { %s390_s23 = smov [#allocation13]  }
 0x39e   :  { %281 = dma.smem_to_hbm %s390_s23, 16, %s470_s3, [#allocation10]  }
 0x39f   :  { %382 = dma.done.wait [#allocation10], 16  }
 0x3a0   :  { %383 = vsyncadd [#allocation10], 4294967280 }
 0x3a1   :  { %285 = sfence }
 0x3a2   :  { %286 = vsyncpa [#allocation9], 1 }
 0x3a3   :  { %287 = vsyncpa [#allocation12], 1 }
 0x3a4   :  { %288 = vsyncpa [#allocation10], 1 }

</bundles_post_ra>
